<compile_context>
chip_gen: v5e
topology: v5e:2x2
jax: 0.10.0
libtpu: 0.0.40
codegen_flags: <defaults>
</compile_context>

<pallas_src>
import jax
import jax.numpy as jnp
from jax.experimental import pallas as pl
from jax.experimental.pallas import tpu as pltpu


def _folding_lane_split_kernel(x_ref, o_ref):
    # x_ref: (TH, 2*S) VMEM tile; o_ref: (TH, S).  S % 128 == 0 on this path,
    # so both static slices are lane-aligned: two dense vreg loads + one VPU
    # add, stored to a lane-dense output slab.
    s = o_ref.shape[-1]
    o_ref[...] = x_ref[:, pl.ds(0, s)] + x_ref[:, pl.ds(s, s)]


def _folding_strided_rows_kernel(x_ref, o_ref):
    # Fallback: x_ref: (2*TH, S) dense block of interleaved channel rows;
    # even/odd rows picked with strided sublane slices.  The XLU shuffle slots
    # are idle in this mem-bound kernel, so the strided reads are free-ish and
    # there is no sublane-padded size-2 axis in VMEM.
    th = o_ref.shape[0]
    o_ref[...] = (x_ref[pl.ds(0, th, stride=2), :]
                  + x_ref[pl.ds(1, th, stride=2), :])


def _sublane(dtype) -> int:
    # Sub-32-bit dtypes pack along sublanes: 8 rows f32, 16 bf16, 32 int8/fp8.
    return max(8, 32 // jnp.dtype(dtype).itemsize)


def _default_block_bytes() -> int:
    """Input-block budget sized to the local generation's scoped-VMEM default.
    Resident VMEM ~ 2x(in_block + out_block) = 3x the input block."""
    try:
        kind = jax.devices()[0].device_kind.lower()
    except Exception:
        kind = ""
    if "v6" in kind or "v7" in kind:
        return 8 << 20      # 32 MiB scoped default -> ~24 MiB resident
    return 4 << 20          # 16 MiB scoped default (v5e) -> ~12 MiB resident


def _pick_row_tile(rows: int, in_row_bytes: int, budget_bytes: int,
                   sublane: int) -> int:
    """Output-row tile TH.  Multiple of `sublane` unless it equals `rows`
    (full-dim blocks are exempt from the (8,128) rule).  The grid is
    pl.cdiv(rows, TH), so TH need not divide rows (ragged last block is safe
    for this elementwise add: padded reads only land in dropped output rows)."""
    if rows <= sublane:
        return rows
    by_budget = max(sublane,
                    (budget_bytes // max(1, in_row_bytes)) // sublane * sublane)
    if rows >= 4 * sublane:
        # Keep >= 4 grid steps when there is enough work: amortizes pipeline
        # fill/drain and lets v7x's two TensorCores both get blocks.
        by_split = max(sublane, (rows // 4) // sublane * sublane)
    else:
        by_split = rows
    return min(rows, by_budget, by_split)


def folding(x: jax.Array, *, target_block_bytes: int | None = None) -> jax.Array:
    """x: (B, C, S) with C even. Returns (B, C//2, S) = pairwise channel sum."""
    b, c, s = x.shape
    assert c % 2 == 0, "Folding requires an even channel count"
    half = c // 2
    rows = b * half
    itemsize = jnp.dtype(x.dtype).itemsize
    if target_block_bytes is None:
        target_block_bytes = _default_block_bytes()

    # One input "row" per output row holds both paired channels: 2*S elems.
    in_row_bytes = 2 * s * itemsize
    th = _pick_row_tile(rows, in_row_bytes, target_block_bytes, _sublane(x.dtype))
    grid = (pl.cdiv(rows, th),)

    # Purely HBM-bound: 2 bytes read per output byte, one VPU add per element.
    cost = pl.CostEstimate(flops=rows * s, transcendentals=0,
                           bytes_accessed=3 * rows * s * itemsize)
    cparams = pltpu.CompilerParams(dimension_semantics=("parallel",))
    out_shape = jax.ShapeDtypeStruct((rows, s), x.dtype)
    out_spec = pl.BlockSpec((th, s), lambda i: (i, 0))

    if s % 128 == 0:
        # Lane-split fast path: contiguous row-major view, pair axis in lanes.
        x2 = x.reshape(rows, 2 * s)
        out = pl.pallas_call(
            _folding_lane_split_kernel,
            out_shape=out_shape,
            grid=grid,
            in_specs=[pl.BlockSpec((th, 2 * s), lambda i: (i, 0))],
            out_specs=out_spec,
            compiler_params=cparams,
            cost_estimate=cost,
        )(x2)
    else:
        # Dense-row fallback for lane-unaligned S: interleaved rows, strided
        # sublane slices in-kernel (no sublane-padded size-2 pair axis).
        x2 = x.reshape(b * c, s)
        out = pl.pallas_call(
            _folding_strided_rows_kernel,
            out_shape=out_shape,
            grid=grid,
            in_specs=[pl.BlockSpec((2 * th, s), lambda i: (i, 0))],
            out_specs=out_spec,
            compiler_params=cparams,
            cost_estimate=cost,
        )(x2)

    return out.reshape(b, half, s)


if __name__ == "__main__":
    key = jax.random.PRNGKey(0)

    def check(b, c, s, dtype=jnp.float32, atol=1e-5, **kw):
        x = jax.random.normal(jax.random.fold_in(key, 1000 * c + s),
                              (b, c, s), dtype=jnp.float32).astype(dtype)
        out = folding(x, **kw)
        jax.block_until_ready(out)
        ref = x.reshape(b, c // 2, 2, s).sum(axis=2)  # mirrors PyTorch forward
        assert out.shape == (b, c // 2, s), out.shape
        assert out.dtype == x.dtype
        assert jnp.allclose(out.astype(jnp.float32), ref.astype(jnp.float32),
                            atol=atol, rtol=1e-2 if dtype == jnp.bfloat16 else 1e-5), \
            "mismatch vs reference"

    # Fast lane-split path, single full-dim block.
    check(2, 8, 128)
    # Fast path, tiled rows with a ragged last block (rows=30, TH=8, 4 steps).
    check(3, 20, 128, target_block_bytes=8 * 1024)
    # S not a multiple of 128 -> dense strided-row fallback, single block.
    check(2, 6, 48)
    # Fallback path, tiled rows with a ragged last block (rows=10, TH=8).
    check(1, 20, 48, target_block_bytes=2 * 1024)
    # bf16: dtype-aware sublane rounding (TH multiple of 16), 4-step grid.
    check(2, 64, 128, dtype=jnp.bfloat16, atol=1e-2, target_block_bytes=8 * 1024)

    print("KERNEL_OK")
</pallas_src>

<mosaic_0001>
module attributes {stable_mosaic.version = 11 : i64} {
  func.func @_folding_lane_split_kernel(%arg0: i32, %arg1: memref<8x256xf32, #tpu.memory_space<vmem>>, %arg2: memref<8x128xf32, #tpu.memory_space<vmem>>) attributes {dimension_semantics = [#tpu.dimension_semantics<parallel>], iteration_bounds = array<i64: 1>, scalar_prefetch = 0 : i64, scratch_operands = 0 : i64, tpu.core_type = #tpu.core_type<tc>, window_params = [{transform_indices = @transform_0, window_bounds = array<i64: 8, 256>}, {transform_indices = @transform_1, window_bounds = array<i64: 8, 128>}]} {
    %c0 = arith.constant 0 : index
    %c0_0 = arith.constant 0 : index
    %0 = vector.load %arg1[%c0, %c0_0] : memref<8x256xf32, #tpu.memory_space<vmem>>, vector<8x128xf32>
    %c0_1 = arith.constant 0 : index
    %c128 = arith.constant 128 : index
    %1 = vector.load %arg1[%c0_1, %c128] : memref<8x256xf32, #tpu.memory_space<vmem>>, vector<8x128xf32>
    %2 = arith.addf %0, %1 : vector<8x128xf32>
    %c0_2 = arith.constant 0 : index
    %c0_3 = arith.constant 0 : index
    %3 = vector.load %arg2[%c0_2, %c0_3] : memref<8x128xf32, #tpu.memory_space<vmem>>, vector<8x128xf32>
    tpu.vector_store %arg2[%c0_2, %c0_3], %2 {strides = array<i32>} : memref<8x128xf32, #tpu.memory_space<vmem>>, vector<8x128xf32>,
    return
  }
  func.func @transform_0(%arg0: i32) -> (i32, i32) {
    %c0_i32 = arith.constant 0 : i32
    %c0_i32_0 = arith.constant 0 : i32
    return %arg0, %c0_i32 : i32, i32
  }
  func.func @transform_1(%arg0: i32) -> (i32, i32) {
    %c0_i32 = arith.constant 0 : i32
    %c0_i32_0 = arith.constant 0 : i32
    return %arg0, %c0_i32 : i32, i32
  }
}

</mosaic_0001>

<bundles_post_ra>
// kernel: tpu_custom_call.1
= control target key start
LH: loop header
LB: loop body
LE: loop exit
PB: predicated region body
PF: predicated region fallthrough
CT: control target
= control target key end

     0   :  { %6 = vsyncpa [#allocation3], 0  ;;  %s116_s0 = inlined_call_operand.hbm [shape: f32[8,256], index: 0, kind: input, shape index: {}]   ;;  %s117_s1 = inlined_call_operand.hbm [shape: f32[8,128], index: 1, kind: output, shape index: {}]  }
   0x1   :  { %7 = vsyncpa [#allocation4], 0  ;;  %s13_s8 = sshll.u32 %s116_s0, 4  ;;  %s98_s9 = smov [#allocation2]   ;;  %s14_s8 = int_to_ptr.hbm [resolvable:$true] %s13_s8 }
   0x2   :  { %s15_s10 = sshll.u32 %s98_s9, 4  ;;  %s16_s10 = int_to_ptr.vmem [resolvable:$true] %s15_s10 }
   0x3   :  { %18 = dma.hbm_to_vmem [thread:$0]  %s14_s8, 256, %s16_s10, [#allocation3]  }
   0x4   :  { %94 = dma.done.wait [#allocation3], 256  }
   0x5   :  { %95 = vsyncadd [#allocation3], 4294967040  ;;  %s99_s11 = smov [#allocation5]   ;;  %s34_s15 = sshll.u32 %s117_s1, 4  ;;  %v23_v0 = vld [vmem:[#allocation2] sm:$0xff]  ;;  %v24_v1 = vld [vmem:[#allocation2 + $0x8] sm:$0xff]  ;;  %s35_s15 = int_to_ptr.hbm [resolvable:$true] %s34_s15 }
   0x6   :  { %s32_s12 = sshll.u32 %s99_s11, 4  ;;  %v25_v2 = vadd.f32 %v24_v1, %v23_v0  ;;  %s33_s12 = int_to_ptr.vmem [resolvable:$true] %s32_s12 }
   0x8   :  { %26 = vst [vmem:[#allocation5] sm:$0xff] %v25_v2 }
   0x9   :  { %37 = dma.vmem_to_hbm [thread:$0]  %s33_s12, 128, %s35_s15, [#allocation4]  }
   0xa   :  { %96 = dma.done.wait [#allocation4], 128  }
   0xb   :  { %97 = vsyncadd [#allocation4], 4294967168 }
   0xc   :  { %42 = vsyncpa [#allocation3], 1 }
   0xd   :  { %43 = vsyncpa [#allocation4], 1 }

</bundles_post_ra>
